<compile_context>
chip_gen: v6e
topology: v6e:2x2x1
jax: 0.10.0
libtpu: 0.0.40
codegen_flags: <defaults>
</compile_context>

<pallas_src>
import jax
import jax.numpy as jnp
from jax.experimental import pallas as pl
from jax.experimental.pallas import tpu as pltpu


def _reward_func_v2(x):
    # TODO(synk): reward_func_v2 is referenced but never defined in the source
    # module; using log2(1 + x) (rate-style reward) as a deterministic stand-in,
    # applied identically to both branches as in the torch forward.
    return jnp.log2(1.0 + x)


def critic_kernel(ph_t_ref, a_ref, r_ref):
    # ph_t_ref : [M, 2B]  phases; cols 0..B-1 = state, B..2B-1 = action
    # a_ref    : [2K, M]  packed channel [Hr.T ; Hi.T]
    # r_ref    : [1, 2B]  reward(mean power) per column (lane-dense row)
    m = ph_t_ref.shape[0]
    k = a_ref.shape[0] // 2
    inv_km = 1.0 / (float(k) * float(m))   # folds mean over K + (1/sqrt(M))^2 scale

    ph = ph_t_ref[...]
    # phase2bf: exp(1j*ph) -> (cos, sin). Batch rides the lane axis (2B = 128)
    # so this EUP pass — the critical unit — uses full vregs.
    c = jnp.cos(ph)                                                # [M, 2B]
    s = jnp.sin(ph)                                                # [M, 2B]

    a = a_ref[...]                                                 # [2K, M]
    # Split matmuls instead of concat: [Hr.T@c ; Hi.T@c] and [Hr.T@s ; Hi.T@s].
    ac = jnp.dot(a, c, preferred_element_type=jnp.float32)         # [2K, 2B]
    as_ = jnp.dot(a, s, preferred_element_type=jnp.float32)        # [2K, 2B]

    # zr.T = Hr.T@c + Hi.T@s ;  zi.T = Hi.T@c - Hr.T@s
    # (sublane slices at offset K; keep K a multiple of 8 for aligned layout)
    zr = ac[:k] + as_[k:]                                          # [K, 2B]
    zi = ac[k:] - as_[:k]                                          # [K, 2B]
    z = zr * zr + zi * zi                                          # [K, 2B]

    # mean over K (plus beamforming scale) as a free sublane reduction.
    p = jnp.sum(z, axis=0, keepdims=True) * inv_km                 # [1, 2B]
    r_ref[...] = _reward_func_v2(p)


@jax.jit
def _critic_forward_packed(state, action, a_packed):
    b, _ = state.shape
    # Stack state+action with the batch on the lane axis.
    # TODO(synk): for very large B this XLA-side transpose is one extra HBM
    # pass; switch to an in-kernel XLU transpose / dot_general(trans_b) then.
    ph_t = jnp.concatenate([state.T, action.T], axis=1)            # [M, 2B]
    vmem = pl.BlockSpec(memory_space=pltpu.MemorySpace.VMEM)
    r = pl.pallas_call(
        critic_kernel,
        out_shape=jax.ShapeDtypeStruct((1, 2 * b), jnp.float32),
        in_specs=[vmem, vmem],
        out_specs=vmem,
    )(ph_t, a_packed)
    # reward(u_min) - reward(z_min): action half minus state half, done here so
    # the kernel's output store stays a full unmasked 128-lane row.
    out = r[:, b:] - r[:, :b]
    return out.reshape(b, 1)   # match torch's .reshape(-1, 1)


class Critic:
    """JAX/Pallas mirror of the torch Critic; channel packed once in __init__."""

    def __init__(self, input_size, output_size, ch, H_r, H_i):
        del ch, output_size
        self.M = int(input_size) // 2
        h_r = jnp.asarray(H_r, jnp.float32)   # [M, K]
        h_i = jnp.asarray(H_i, jnp.float32)   # [M, K]
        # Single [2K, M] weight (half the VMEM/DMA of a [2K, 2M] block packing).
        self.a_packed = jax.device_put(jnp.concatenate([h_r.T, h_i.T], axis=0))

    def __call__(self, state, action):
        return _critic_forward_packed(state, action, self.a_packed)


def critic_reference(state, action, h_r, h_i):
    """Pure-JAX reference mirroring the torch forward exactly."""
    m = state.shape[1]
    scale = 1.0 / jnp.sqrt(jnp.float32(m))

    def branch(ph):
        xr = jnp.cos(ph) * scale
        xi = jnp.sin(ph) * scale
        zr = xr @ h_r + xi @ h_i
        zi = xr @ h_i - xi @ h_r
        z = zr ** 2 + zi ** 2
        return jnp.mean(z, axis=1, keepdims=True)

    return _reward_func_v2(branch(action)) - _reward_func_v2(branch(state))


if __name__ == "__main__":
    # M = 8 antennas, K = 16 channel columns (multiple of 8 for aligned slices),
    # B = 64 so 2B = 128 fills the lane axis (per performance feedback).
    B, M, K = 64, 8, 16
    key = jax.random.PRNGKey(0)
    k1, k2, k3, k4 = jax.random.split(key, 4)

    # phases in [0, 2*pi), matching the DDPG beamforming setting
    state = jax.random.uniform(k1, (B, M), jnp.float32, 0.0, 2.0 * jnp.pi)
    action = jax.random.uniform(k2, (B, M), jnp.float32, 0.0, 2.0 * jnp.pi)
    # deterministic synthetic channel matrices (stand-ins for H_r, H_i numpy arrays)
    H_r = jax.random.normal(k3, (M, K), jnp.float32)
    H_i = jax.random.normal(k4, (M, K), jnp.float32)

    critic = Critic(input_size=2 * M, output_size=1, ch=None, H_r=H_r, H_i=H_i)
    out = critic(state, action)
    out = jax.block_until_ready(out)

    ref = critic_reference(state, action, H_r, H_i)
    assert out.shape == (B, 1)
    assert jnp.allclose(out, ref, rtol=1e-4, atol=1e-4), (out, ref)

    print("KERNEL_OK")
</pallas_src>

<mosaic_0001>
module attributes {stable_mosaic.version = 11 : i64} {
  func.func @critic_kernel(%arg0: memref<8x128xf32, #tpu.memory_space<vmem>>, %arg1: memref<32x8xf32, #tpu.memory_space<vmem>>, %arg2: memref<1x128xf32, #tpu.memory_space<vmem>>) attributes {dimension_semantics = [], scalar_prefetch = 0 : i64, scratch_operands = 0 : i64, tpu.core_type = #tpu.core_type<tc>} {
    %c0 = arith.constant 0 : index
    %c0_0 = arith.constant 0 : index
    %0 = vector.load %arg0[%c0, %c0_0] : memref<8x128xf32, #tpu.memory_space<vmem>>, vector<8x128xf32>
    %1 = math.cos %0 : vector<8x128xf32>
    %2 = math.sin %0 : vector<8x128xf32>
    %c0_1 = arith.constant 0 : index
    %c0_2 = arith.constant 0 : index
    %3 = vector.load %arg1[%c0_1, %c0_2] : memref<32x8xf32, #tpu.memory_space<vmem>>, vector<32x8xf32>
    %cst = arith.constant dense<0.000000e+00> : vector<32x128xf32>
    %4 = tpu.matmul %3, %1, %cst {dimension_numbers = #tpu.dot_dimension_numbers<[1], [0], [0], [1], [0, 0, 1, 1], [], []>} : vector<32x8xf32>, vector<8x128xf32>, vector<32x128xf32> -> vector<32x128xf32>
    %cst_3 = arith.constant dense<0.000000e+00> : vector<32x128xf32>
    %5 = tpu.matmul %3, %2, %cst_3 {dimension_numbers = #tpu.dot_dimension_numbers<[1], [0], [0], [1], [0, 0, 1, 1], [], []>} : vector<32x8xf32>, vector<8x128xf32>, vector<32x128xf32> -> vector<32x128xf32>
    %6 = vector.extract_strided_slice %4 {offsets = [0, 0], sizes = [16, 128], strides = [1, 1]} : vector<32x128xf32> to vector<16x128xf32>
    %7 = vector.extract_strided_slice %5 {offsets = [16, 0], sizes = [16, 128], strides = [1, 1]} : vector<32x128xf32> to vector<16x128xf32>
    %8 = arith.addf %6, %7 : vector<16x128xf32>
    %9 = vector.extract_strided_slice %4 {offsets = [16, 0], sizes = [16, 128], strides = [1, 1]} : vector<32x128xf32> to vector<16x128xf32>
    %10 = vector.extract_strided_slice %5 {offsets = [0, 0], sizes = [16, 128], strides = [1, 1]} : vector<32x128xf32> to vector<16x128xf32>
    %11 = arith.subf %9, %10 : vector<16x128xf32>
    %12 = arith.mulf %8, %8 : vector<16x128xf32>
    %13 = arith.mulf %11, %11 : vector<16x128xf32>
    %14 = arith.addf %12, %13 : vector<16x128xf32>
    %cst_4 = arith.constant dense<0.000000e+00> : vector<128xf32>
    %15 = vector.multi_reduction <add>, %14, %cst_4 [0] : vector<16x128xf32> to vector<128xf32>
    %16 = vector.shape_cast %15 : vector<128xf32> to vector<1x128xf32>
    %cst_5 = arith.constant 7.812500e-03 : f32
    %17 = vector.broadcast %cst_5 : f32 to vector<1x128xf32>
    %18 = arith.mulf %16, %17 : vector<1x128xf32>
    %cst_6 = arith.constant 1.000000e+00 : f32
    %19 = vector.broadcast %cst_6 : f32 to vector<1x128xf32>
    %20 = arith.addf %19, %18 : vector<1x128xf32>
    %21 = math.log %20 : vector<1x128xf32>
    %cst_7 = arith.constant 2.000000e+00 : f32
    %22 = math.log %cst_7 : f32
    %23 = vector.broadcast %22 : f32 to vector<1x128xf32>
    %24 = arith.divf %21, %23 : vector<1x128xf32>
    %c0_8 = arith.constant 0 : index
    %c0_9 = arith.constant 0 : index
    %25 = vector.load %arg2[%c0_8, %c0_9] : memref<1x128xf32, #tpu.memory_space<vmem>>, vector<1x128xf32>
    tpu.vector_store %arg2[%c0_8, %c0_9], %24 {strides = array<i32>} : memref<1x128xf32, #tpu.memory_space<vmem>>, vector<1x128xf32>,
    return
  }
}

</mosaic_0001>

<bundles_post_ra>
// kernel: _critic_forward_packed.1
= control target key start
LH: loop header
LB: loop body
LE: loop exit
PB: predicated region body
PF: predicated region fallthrough
CT: control target
= control target key end

     0   :  { %vm223_vm0 = vcmask 64512   ;;  %v492_v13 = vmov 683565275   ;;  %v493_v15 = vmov 2475754826   ;;  %s560_s0 = inlined_call_operand.vmem [shape: f32[8,128], index: 0, kind: input, shape index: {}]   ;;  %s561_s1 = inlined_call_operand.vmem [shape: f32[32,8], index: 1, kind: input, shape index: {}]   ;;  %s562_s2 = inlined_call_operand.vmem [shape: f32[1,128], index: 2, kind: output, shape index: {}]  }
   0x1   :  { %v516_v0 = vld [vmem:[%s560_s0] sm:$0xff]  ;;  %v494_v17 = vmov 2131351028   ;;  %v495_v19 = vmov 2102212464  }
   0x2   :  { %v219_v1 = vld [vmem:[%s561_s1] sm:$0xff]  ;;  %v15_v2 = vand.u32 2139095040, %v516_v0  ;;  %v12_v4 = vand.u32 2147483647, %v516_v0  ;;  %v496_v21 = vmov 920167782  }
   0x3   :  { %462 = vmatprep.mubr.msk.f32.mxu0 %vm223_vm0, %v219_v1  ;;  %470 = vmatprep.mubr.msk.f32.mxu1 %vm223_vm0, %v219_v1  ;;  %v497_v28 = vmov 1326507024   ;;  %vm14_vm8 = vcmp.lt.s32.totalorder %v516_v0, 0 }
   0x4   :  { %v16_v3 = vshrl.u32 %v15_v2, 23  ;;  %v19_v7 = vand.u32 8388607, %v12_v4  ;;  %vm13_vm9 = vcmp.le.f32.partialorder %v12_v4, 0.7853982 }
   0x6   :  { %v434_v5 = vadd.s32 4294967169, %v16_v3  ;;  %v20_v10 = vor.u32 8388608, %v19_v7 }
   0x8   :  { %v22_v6 = vadd.s32 1, %v434_v5  ;;  %v60_v30 = vshll.u32 %v20_v10, 8 }
   0xa   :  { %vm23_vm1 = vcmp.gt.s32.totalorder %v22_v6, 0 }
   0xb   :  { %v24_v8 = vsel %vm23_vm1, %v22_v6, 0  ;;  %vm104_vm1 = vweird.f32 %v516_v0 }
   0xc   :  { %v26_v9 = vand.u32 31, %v24_v8  ;;  %v25_v11 = vshrl.u32 %v24_v8, 5 }
   0xe   :  { %v27_v12 = vsub.s32 32, %v26_v9  ;;  %v29_v14 = vshll.u32 %v492_v13, %v26_v9  ;;  %v32_v16 = vshll.u32 %v493_v15, %v26_v9  ;;  %v35_v18 = vshll.u32 %v494_v17, %v26_v9 }
   0xf   :  { %v38_v20 = vshll.u32 %v495_v19, %v26_v9  ;;  %v41_v22 = vshll.u32 %v496_v21, %v26_v9  ;;  %vm44_vm2 = vcmp.lt.s32.totalorder %v25_v11, 1  ;;  %vm47_vm3 = vcmp.lt.s32.totalorder %v25_v11, 4 }
  0x10   :  { %v28_v23 = vshrl.u32 %v492_v13, %v27_v12  ;;  %v30_v24 = vshrl.u32 %v493_v15, %v27_v12  ;;  %v33_v25 = vshrl.u32 %v494_v17, %v27_v12  ;;  %v36_v26 = vshrl.u32 %v495_v19, %v27_v12 }
  0x11   :  { %v39_v27 = vshrl.u32 %v496_v21, %v27_v12  ;;  %v42_v29 = vshrl.u32 %v497_v28, %v27_v12  ;;  %vm45_vm4 = vcmp.lt.s32.totalorder %v25_v11, 2  ;;  %vm46_vm5 = vcmp.lt.s32.totalorder %v25_v11, 3 }
  0x12   :  { %v31_v31 = vor.u32 %v30_v24, %v29_v14  ;;  %v34_v32 = vor.u32 %v33_v25, %v32_v16  ;;  %v37_v33 = vor.u32 %v36_v26, %v35_v18 }
  0x13   :  { %v40_v34 = vor.u32 %v39_v27, %v38_v20  ;;  %v43_v35 = vor.u32 %v42_v29, %v41_v22 }
  0x14   :  { %v48_v36 = vsel %vm44_vm2, %v28_v23, %v31_v31  ;;  %v49_v37 = vsel %vm47_vm3, %v37_v33, 2102212464  ;;  %v52_v38 = vsel %vm44_vm2, %v31_v31, %v34_v32  ;;  %v56_v39 = vsel %vm44_vm2, %v34_v32, %v37_v33 }
  0x15   :  { %v50_v40 = vsel %vm46_vm5, %v34_v32, %v49_v37  ;;  %v53_v41 = vsel %vm47_vm3, %v40_v34, 920167782  ;;  %v57_v42 = vsel %vm47_vm3, %v43_v35, 1326507024  ;;  %v220_v35 = vld [vmem:[%s561_s1 + $0x8] sm:$0xff] }
  0x16   :  { %v54_v43 = vsel %vm46_vm5, %v37_v33, %v53_v41  ;;  %v58_v44 = vsel %vm46_vm5, %v40_v34, %v57_v42  ;;  %v51_v45 = vsel %vm45_vm4, %v48_v36, %v50_v40  ;;  %v221_v36 = vld [vmem:[%s561_s1 + $0x10] sm:$0xff] }
  0x17   :  { %v55_v46 = vsel %vm45_vm4, %v52_v38, %v54_v43  ;;  %v59_v47 = vsel %vm45_vm4, %v56_v39, %v58_v44  ;;  %v67_v52 = vmul.u32 %v60_v30, %v51_v45 }
  0x18   :  { %v527_v48 = vmul.u32.u64.low %v60_v30, %v59_v47  ;;  %v528_v49 = vmul.u32.u64.high %v60_v30, %v59_v47, %v527_v48  ;;  %v530_v50 = vmul.u32.u64.low %v60_v30, %v55_v46  ;;  %v531_v51 = vmul.u32.u64.high %v60_v30, %v55_v46, %v530_v50 }
  0x1a   :  { %vm69_vm6 = vc.u32 %v528_v49, %v530_v50  ;;  %v70_v53 = vadd.s32 1, %v531_v51  ;;  %v68_v1 = vadd.s32 %v530_v50, %v528_v49 }
  0x1c   :  { %v71_v54 = vsel %vm69_vm6, %v70_v53, %v531_v51 }
  0x1d   :  { %v72_v55 = vadd.s32 %v71_v54, %v67_v52 }
  0x1f   :  { %v73_v56 = vadd.s32 536870912, %v72_v55 }
  0x21   :  { %v74_v57 = vshrl.u32 %v73_v56, 30 }
  0x23   :  { %v75_v58 = vshll.u32 %v74_v57, 30  ;;  %v98_v15 = vsub.s32 4, %v74_v57 }
  0x25   :  { %v76_v59 = vsub.s32 %v72_v55, %v75_v58  ;;  %v99_v18 = vsel %vm14_vm8, %v98_v15, %v74_v57 }
  0x26   :  { %v101_v20 = vsel %vm13_vm9, 0, %v99_v18 }
  0x27   :  { %v78_v60 = vsub.s32 0, %v76_v59  ;;  %v208_v21 = vadd.s32 3, %v101_v20  ;;  %v105_v22 = vand.u32 3, %v101_v20 }
  0x29   :  { %v435_v61 = vmin.u32 %v78_v60, %v76_v59  ;;  %v209_v23 = vand.u32 3, %v208_v21  ;;  %vm110_vm10 = vcmp.eq.s32.totalorder %v105_v22, 2  ;;  %vm107_vm12 = vcmp.eq.s32.totalorder %v105_v22, 0 }
  0x2a   :  { %vm106_vm14 = vcmp.lt.s32.totalorder %v105_v22, 2 }
  0x2b   :  { %v80_v62 = vclz %v435_v61  ;;  %vm214_vm11 = vcmp.eq.s32.totalorder %v209_v23, 2  ;;  %vm211_vm13 = vcmp.eq.s32.totalorder %v209_v23, 0  ;;  %vm210_vm15 = vcmp.lt.s32.totalorder %v209_v23, 2 }
  0x2d   :  { %v436_v63 = vadd.s32 4294967294, %v80_v62 }
  0x2f   :  { %vm437_vm7 = vcmp.lt.s32.totalorder %v436_v63, 0 }
  0x30   :  { %v83_v2 = vsel %vm437_vm7, 0, %v436_v63 }
  0x31   :  { %v84_v3 = vsub.s32 32, %v83_v2  ;;  %v85_v5 = vshll.u32 %v76_v59, %v83_v2  ;;  %v88_v6 = vsub.s32 4294967266, %v83_v2 }
  0x33   :  { %v86_v7 = vshrl.u32 %v68_v1, %v84_v3  ;;  %v89_v8 = vadd.s32 127, %v88_v6 }
  0x35   :  { %v87_v9 = vor.u32 %v86_v7, %v85_v5  ;;  %v90_v10 = vshll.u32 %v89_v8, 23 }
  0x37   :  { %v91_v11 = vor.u32 4788187, %v90_v10  ;;  %v94_v12 = vcvt.s32.f32 %v87_v9 }
  0x39   :  { %v92_v13 = vand.u32 2147483647, %v91_v11 }
  0x3b   :  { %v95_v14 = vmul.f32 %v94_v12, %v92_v13 }
  0x3d   :  { %v96_v16 = vxor.u32 2147483648, %v95_v14 }
  0x3f   :  { %v97_v17 = vsel %vm14_vm8, %v96_v16, %v95_v14 }
  0x40   :  { %v100_v19 = vsel %vm13_vm9, %v516_v0, %v97_v17  ;;  %v222_v0 = vld [vmem:[%s561_s1 + $0x18] sm:$0xff] }
  0x41   :  { %486 = vcosq.f32 %v100_v19 }
  0x42   :  { %488 = vsinq.f32 %v100_v19 }
  0x4e   :  { %v487_v24 = vpop.eup %486 }
  0x4f   :  { %v489_v25 = vpop.eup %488  ;;  %v111_v26 = vxor.u32 2147483648, %v487_v24 }
  0x50   :  { %v108_v4 = vxor.u32 2147483648, %v489_v25 }
  0x51   :  { %v112_v27 = vsel %vm110_vm10, %v111_v26, %v489_v25  ;;  %v216_v28 = vsel %vm214_vm11, %v111_v26, %v489_v25 }
  0x52   :  { %v109_v29 = vsel %vm107_vm12, %v487_v24, %v108_v4  ;;  %v213_v30 = vsel %vm211_vm13, %v487_v24, %v108_v4 }
  0x53   :  { %v113_v31 = vsel %vm106_vm14, %v109_v29, %v112_v27  ;;  %v217_v32 = vsel %vm210_vm15, %v213_v30, %v216_v28 }
  0x54   :  { %v114_v33 = vsel %vm104_vm1, nan, %v113_v31  ;;  %v218_v34 = vsel %vm104_vm1, nan, %v217_v32 }
  0x55   :  { %460 = vmatprep.subr.mxu0 %v114_v33  ;;  %468 = vmatprep.subr.mxu1 %v218_v34 }
  0x56   :  { %461 = vmatpush3.msra.mxu0 %v114_v33  ;;  %469 = vmatpush3.msra.mxu1 %v218_v34 }
  0x57   :  { %463 = vmatmul.mubr.msk.f32.vlgmr.msra.gmra.mxu0 %vm223_vm0, %v220_v35  ;;  %471 = vmatmul.mubr.msk.f32.vlgmr.msra.gmra.mxu1 %vm223_vm0, %v220_v35 }
  0x58   :  { %465 = vmatprep.mubr.msk.f32.mxu0 %vm223_vm0, %v221_v36  ;;  %473 = vmatprep.mubr.msk.f32.mxu1 %vm223_vm0, %v221_v36 }
  0x5b   :  { %466 = vmatmul.mubr.msk.f32.gmra.mxu0 %vm223_vm0, %v222_v0  ;;  %474 = vmatmul.mubr.msk.f32.gmra.mxu1 %vm223_vm0, %v222_v0 }
 0x117   :  { %v464_v37 = vpop.f32.mrf.mxu0  ;;  %v472_v38 = vpop.f32.mrf.mxu1 }
 0x119   :  { %v302_v39 = vpop.f32.mrf.mxu0  ;;  %v387_v40 = vpop.f32.mrf.mxu1 }
 0x11b   :  { %v467_v41 = vpop.f32.mrf.mxu0  ;;  %v475_v42 = vpop.f32.mrf.mxu1 }
 0x11c   :  { %v409_v43 = vsub.f32 %v467_v41, %v472_v38  ;;  %v407_v44 = vadd.f32 %v475_v42, %v464_v37 }
 0x11d   :  { %v312_v45 = vpop.f32.mrf.mxu0  ;;  %v397_v46 = vpop.f32.mrf.mxu1 }
 0x11e   :  { %v413_v47 = vmul.f32 %v409_v43, %v409_v43  ;;  %v411_v48 = vmul.f32 %v407_v44, %v407_v44  ;;  %v408_v49 = vsub.f32 %v312_v45, %v387_v40  ;;  %v406_v50 = vadd.f32 %v397_v46, %v302_v39 }
 0x120   :  { %v412_v51 = vmul.f32 %v408_v49, %v408_v49  ;;  %v410_v52 = vmul.f32 %v406_v50, %v406_v50  ;;  %v415_v53 = vadd.f32 %v413_v47, %v411_v48 }
 0x122   :  { %v414_v54 = vadd.f32 %v412_v51, %v410_v52 }
 0x124   :  { %v416_v55 = vadd.f32 %v415_v53, %v414_v54 }
 0x126   :  { %v417_v56 = vrot.slane %v416_v55, 4 }
 0x128   :  { %v418_v57 = vadd.f32 %v417_v56, %v416_v55 }
 0x12a   :  { %v419_v58 = vrot.slane %v418_v57, 2 }
 0x12c   :  { %v420_v59 = vadd.f32 %v419_v58, %v418_v57 }
 0x12e   :  { %v421_v60 = vrot.slane %v420_v59, 1 }
 0x130   :  { %v422_v61 = vadd.f32 %v421_v60, %v420_v59 }
 0x132   :  { %v423_v62 = vmul.f32 0.0078125, %v422_v61 }
 0x134   :  { %v424_v63 = vadd.f32 1.0, %v423_v62 }
 0x136   :  { %490 = vlog2.f32 %v424_v63 }
 0x143   :  { %v491_v1 = vpop.eup %490 }
 0x144   :  { %v426_v2 = vmul.f32 0.6931472, %v491_v1 }
 0x146   :  { %v428_v3 = vmul.f32 1.442695, %v426_v2 }
 0x148   :  { %429 = vst [vmem:[%s562_s2] sm:$0x1] %v428_v3 }

</bundles_post_ra>
